<compile_context>
chip_gen: v5e
topology: v5e:2x2
jax: 0.10.0
libtpu: 0.0.40
codegen_flags: <defaults>
</compile_context>

<pallas_src>
import functools

import jax
import jax.numpy as jnp
from jax import lax
from jax.experimental import pallas as pl
from jax.experimental.pallas import tpu as pltpu

_EPS = 1e-5  # nn.BatchNorm2d default


def _round_up(v, m):
    return -(-v // m) * m


# ---------------------------------------------------------------------------
# Kernels
# ---------------------------------------------------------------------------
def _stats_kernel(x_ref, sum_ref, sq_ref, *, hw_total, hw_tile, mask_cols):
    """Per-row partial sum / sum-of-squares, accumulated over the HW grid axis.

    x_ref:   (r_tile, hw_tile) tile of x viewed as (N*C, H*W)
    sum_ref: (r_tile, 1) f32, resident across the HW ('arbitrary', last) axis
    sq_ref:  (r_tile, 1) f32, same
    """
    hi = pl.program_id(1)

    @pl.when(hi == 0)
    def _():
        sum_ref[...] = jnp.zeros_like(sum_ref)
        sq_ref[...] = jnp.zeros_like(sq_ref)

    x = x_ref[...].astype(jnp.float32)
    if mask_cols:
        # Tail columns of the last (partial) HW block hold undefined data.
        col = hi * hw_tile + lax.broadcasted_iota(jnp.int32, x.shape, 1)
        x = jnp.where(col < hw_total, x, 0.0)

    sum_ref[...] += jnp.sum(x, axis=1, keepdims=True)      # lane reduce (XLU)
    sq_ref[...] += jnp.sum(x * x, axis=1, keepdims=True)


def _apply_kernel(a_ref, b_ref, x_ref, o_ref):
    """out = a * x + b with per-row fused coefficients (single FMA)."""
    x = x_ref[...].astype(jnp.float32)                      # (r_tile, hw_tile)
    o_ref[...] = (a_ref[...] * x + b_ref[...]).astype(o_ref.dtype)


def _fused_kernel(x_ref, g_ref, bt_ref, o_ref, *, inv_count, eps):
    """Small-input fast path: stats + normalization in one pass, x resident."""
    x = x_ref[...].astype(jnp.float32)                      # (N, C, HW)
    s = jnp.sum(x, axis=2, keepdims=True)                   # (N, C, 1)
    s = jnp.sum(s, axis=0, keepdims=True)                   # (1, C, 1)
    s2 = jnp.sum(x * x, axis=2, keepdims=True)
    s2 = jnp.sum(s2, axis=0, keepdims=True)
    mean = s * inv_count
    var = s2 * inv_count - mean * mean                      # biased variance
    rstd = lax.rsqrt(var + eps)
    a = g_ref[...] * rstd                                   # (N, C, 1)
    b = bt_ref[...] - mean * a
    o_ref[...] = (a * x + b).astype(o_ref.dtype)


# ---------------------------------------------------------------------------
# Generation-aware budgets / tiling
# ---------------------------------------------------------------------------
def _vmem_capacity_bytes():
    try:
        info = pltpu.get_tpu_info()
        cap = getattr(info, "vmem_capacity_bytes", None)
        if cap:
            return int(cap)
    except Exception:
        pass
    return 64 << 20  # conservative (v7x-sized) fallback


def _block_budget(vmem_bytes):
    # v7x: only 64 MiB physical VMEM per TC -> ~3 MiB x-blocks.
    # v5e / v6e: 128 MiB physical -> ~4 MiB blocks (85%+ of HBM roofline).
    return (3 << 20) if vmem_bytes <= (64 << 20) else (4 << 20)


def _pick_tiles(R, HW, itemsize, budget):
    """r_tile multiple of the sublane count, hw_tile multiple of 128, within budget."""
    sub = 8 if itemsize >= 4 else 16
    hw_tile = min(_round_up(HW, 128), 4096)                 # lane-dense, contiguous DMA
    r_cap = max(sub, (budget // (hw_tile * itemsize)) // sub * sub)
    r_tile = min(_round_up(R, sub), r_cap)
    return r_tile, hw_tile, sub


# ---------------------------------------------------------------------------
# Public wrapper (forward pass of ConditionalBatchNorm2d)
# ---------------------------------------------------------------------------
def conditional_batch_norm_2d(x, y, embed_weight, eps=_EPS, force_tiled=False):
    """x: (N, C, H, W); y: (N,) int32 class ids; embed_weight: (num_classes, 2C)."""
    N, C, H, W = x.shape
    HW = H * W
    itemsize = jnp.dtype(x.dtype).itemsize
    inv_count = 1.0 / float(N * HW)

    # Embedding lookup (tiny gather) + chunk(2, dim=1): plain JAX glue.
    emb = embed_weight[y]                                   # (N, 2C)
    gamma = emb[:, :C].astype(jnp.float32)                  # (N, C)
    beta = emb[:, C:].astype(jnp.float32)                   # (N, C)

    vmem_bytes = _vmem_capacity_bytes()
    sub = 8 if itemsize >= 4 else 16

    # ---- Fused fast path: whole working set fits comfortably in VMEM -------
    c_pad = _round_up(C, sub)
    hw_pad = _round_up(HW, 128)
    x_blk = N * c_pad * hw_pad * itemsize
    x_blk_f32 = N * c_pad * hw_pad * 4
    fused_need = 4 * x_blk + 2 * x_blk_f32 + (2 << 20)      # 2-buf in/out + f32 temp
    if (not force_tiled) and fused_need <= min(vmem_bytes // 2, 24 << 20):
        x3 = x.reshape(N, C, HW)
        out3 = pl.pallas_call(
            functools.partial(_fused_kernel, inv_count=inv_count, eps=eps),
            out_shape=jax.ShapeDtypeStruct((N, C, HW), x.dtype),
            grid=(1,),
            in_specs=[
                pl.BlockSpec((N, C, HW), lambda i: (0, 0, 0)),
                pl.BlockSpec((N, C, 1), lambda i: (0, 0, 0)),
                pl.BlockSpec((N, C, 1), lambda i: (0, 0, 0)),
            ],
            out_specs=pl.BlockSpec((N, C, HW), lambda i: (0, 0, 0)),
            compiler_params=pltpu.CompilerParams(
                dimension_semantics=("arbitrary",),
                vmem_limit_bytes=int(min(vmem_bytes // 2, 32 << 20))),
        )(x3, gamma.reshape(N, C, 1), beta.reshape(N, C, 1))
        return out3.reshape(N, C, H, W)

    # ---- Tiled two-phase path ----------------------------------------------
    R = N * C
    x2 = x.reshape(R, HW)
    budget = _block_budget(vmem_bytes)
    r_tile, hw_tile, _ = _pick_tiles(R, HW, itemsize, budget)
    grid = (pl.cdiv(R, r_tile), pl.cdiv(HW, hw_tile))

    block_bytes = r_tile * hw_tile * itemsize
    block_f32 = r_tile * hw_tile * 4
    vmem_limit = int(min(vmem_bytes // 2,
                         max(4 * block_bytes + 2 * block_f32 + (4 << 20), 16 << 20)))

    # Phase 1: per-row partial sums.  Rows 'parallel' (v7x megacore), HW
    # 'arbitrary' (resident per-row accumulator).  Tail columns masked in-kernel.
    stats_sum, stats_sq = pl.pallas_call(
        functools.partial(_stats_kernel, hw_total=HW, hw_tile=hw_tile,
                          mask_cols=(HW % hw_tile != 0)),
        out_shape=(jax.ShapeDtypeStruct((R, 1), jnp.float32),
                   jax.ShapeDtypeStruct((R, 1), jnp.float32)),
        grid=grid,
        in_specs=[pl.BlockSpec((r_tile, hw_tile), lambda ri, hi: (ri, hi))],
        out_specs=(pl.BlockSpec((r_tile, 1), lambda ri, hi: (ri, 0)),
                   pl.BlockSpec((r_tile, 1), lambda ri, hi: (ri, 0))),
        compiler_params=pltpu.CompilerParams(
            dimension_semantics=("parallel", "arbitrary"),
            vmem_limit_bytes=vmem_limit),
    )(x2)

    # Tiny glue: fold per-row partials over N, finalize mean/rstd, fuse a/b.
    s_ch = jnp.sum(stats_sum.reshape(N, C), axis=0)         # (C,)
    sq_ch = jnp.sum(stats_sq.reshape(N, C), axis=0)         # (C,)
    mean = s_ch * inv_count
    var = sq_ch * inv_count - mean * mean                   # biased variance
    rstd = lax.rsqrt(var + eps)
    a = gamma * rstd[None, :]                               # (N, C)
    b = beta - mean[None, :] * a
    a2 = a.reshape(R, 1)
    b2 = b.reshape(R, 1)

    # Phase 2: out = a*x + b (fully parallel, lane-dense stores).
    out2 = pl.pallas_call(
        _apply_kernel,
        out_shape=jax.ShapeDtypeStruct((R, HW), x.dtype),
        grid=grid,
        in_specs=[
            pl.BlockSpec((r_tile, 1), lambda ri, hi: (ri, 0)),
            pl.BlockSpec((r_tile, 1), lambda ri, hi: (ri, 0)),
            pl.BlockSpec((r_tile, hw_tile), lambda ri, hi: (ri, hi)),
        ],
        out_specs=pl.BlockSpec((r_tile, hw_tile), lambda ri, hi: (ri, hi)),
        compiler_params=pltpu.CompilerParams(
            dimension_semantics=("parallel", "parallel"),
            vmem_limit_bytes=vmem_limit),
    )(a2, b2, x2)

    return out2.reshape(N, C, H, W)


# ---------------------------------------------------------------------------
# Pure-JAX reference (matches the PyTorch forward in training mode)
# ---------------------------------------------------------------------------
def _reference(x, y, embed_weight, eps=_EPS):
    N, C, H, W = x.shape
    xf = x.astype(jnp.float32)
    mean = jnp.mean(xf, axis=(0, 2, 3), keepdims=True)
    var = jnp.mean((xf - mean) ** 2, axis=(0, 2, 3), keepdims=True)  # biased
    xhat = (xf - mean) / jnp.sqrt(var + eps)
    emb = embed_weight[y]
    gamma = emb[:, :C].reshape(N, C, 1, 1)
    beta = emb[:, C:].reshape(N, C, 1, 1)
    return (gamma * xhat + beta).astype(x.dtype)


if __name__ == "__main__":
    num_features = 4
    num_classes = 10
    N, H, W = 2, 16, 16

    key = jax.random.PRNGKey(0)
    k_x, k_y, k_emb, k_x2, k_y2 = jax.random.split(key, 5)

    # Parameter init mirroring the module's __init__:
    #   embed.weight[:, :num_features] ~ Normal(1, 0.02), rest zero.
    gamma_init = 1.0 + 0.02 * jax.random.normal(
        k_emb, (num_classes, num_features), dtype=jnp.float32)
    beta_init = jnp.zeros((num_classes, num_features), dtype=jnp.float32)
    embed_weight = jnp.concatenate([gamma_init, beta_init], axis=1)  # (nc, 2C)

    x = jax.random.normal(k_x, (N, num_features, H, W), dtype=jnp.float32)
    y = jax.random.randint(k_y, (N,), 0, num_classes, dtype=jnp.int32)
    ref = _reference(x, y, embed_weight)

    # Fused (small-input) path.
    out_fused = jax.block_until_ready(conditional_batch_norm_2d(x, y, embed_weight))
    assert out_fused.shape == (N, num_features, H, W)
    assert jnp.allclose(out_fused, ref, atol=1e-4, rtol=1e-4), "fused path mismatch"

    # Tiled two-phase path on the same shape.
    out_tiled = jax.block_until_ready(
        conditional_batch_norm_2d(x, y, embed_weight, force_tiled=True))
    assert jnp.allclose(out_tiled, ref, atol=1e-4, rtol=1e-4), "tiled path mismatch"

    # Non-aligned shape (C=3, HW=100): exercises cdiv grids + lane tail masking.
    x_odd = jax.random.normal(k_x2, (2, 3, 10, 10), dtype=jnp.float32)
    emb_odd = jnp.concatenate(
        [1.0 + 0.02 * jax.random.normal(k_emb, (num_classes, 3), dtype=jnp.float32),
         jnp.zeros((num_classes, 3), dtype=jnp.float32)], axis=1)
    y_odd = jax.random.randint(k_y2, (2,), 0, num_classes, dtype=jnp.int32)
    out_odd = jax.block_until_ready(
        conditional_batch_norm_2d(x_odd, y_odd, emb_odd, force_tiled=True))
    assert jnp.allclose(out_odd, _reference(x_odd, y_odd, emb_odd),
                        atol=1e-4, rtol=1e-4), "odd-shape tiled path mismatch"

    print("KERNEL_OK")
</pallas_src>

<mosaic_0001>
module attributes {stable_mosaic.version = 11 : i64} {
  func.func @_fused_kernel(%arg0: i32, %arg1: memref<2x4x256xf32, #tpu.memory_space<vmem>>, %arg2: memref<2x4x1xf32, #tpu.memory_space<vmem>>, %arg3: memref<2x4x1xf32, #tpu.memory_space<vmem>>, %arg4: memref<2x4x256xf32, #tpu.memory_space<vmem>>) attributes {dimension_semantics = [#tpu.dimension_semantics<arbitrary>], iteration_bounds = array<i64: 1>, scalar_prefetch = 0 : i64, scratch_operands = 0 : i64, tpu.core_type = #tpu.core_type<tc>, window_params = [{pipeline_mode = #tpu.pipeline_mode<synchronous>, transform_indices = @transform_0, window_bounds = array<i64: 2, 4, 256>}, {pipeline_mode = #tpu.pipeline_mode<synchronous>, transform_indices = @transform_1, window_bounds = array<i64: 2, 4, 1>}, {pipeline_mode = #tpu.pipeline_mode<synchronous>, transform_indices = @transform_2, window_bounds = array<i64: 2, 4, 1>}, {pipeline_mode = #tpu.pipeline_mode<synchronous>, transform_indices = @transform_3, window_bounds = array<i64: 2, 4, 256>}]} {
    %c0 = arith.constant 0 : index
    %c0_0 = arith.constant 0 : index
    %c0_1 = arith.constant 0 : index
    %0 = vector.load %arg1[%c0, %c0_0, %c0_1] : memref<2x4x256xf32, #tpu.memory_space<vmem>>, vector<2x4x256xf32>
    %cst = arith.constant dense<0.000000e+00> : vector<2x4xf32>
    %1 = vector.multi_reduction <add>, %0, %cst [2] : vector<2x4x256xf32> to vector<2x4xf32>
    %2 = vector.shape_cast %1 : vector<2x4xf32> to vector<2x4x1xf32>
    %cst_2 = arith.constant dense<0.000000e+00> : vector<4x1xf32>
    %3 = vector.multi_reduction <add>, %2, %cst_2 [0] : vector<2x4x1xf32> to vector<4x1xf32>
    %4 = vector.shape_cast %3 : vector<4x1xf32> to vector<1x4x1xf32>
    %5 = arith.mulf %0, %0 : vector<2x4x256xf32>
    %cst_3 = arith.constant dense<0.000000e+00> : vector<2x4xf32>
    %6 = vector.multi_reduction <add>, %5, %cst_3 [2] : vector<2x4x256xf32> to vector<2x4xf32>
    %7 = vector.shape_cast %6 : vector<2x4xf32> to vector<2x4x1xf32>
    %cst_4 = arith.constant dense<0.000000e+00> : vector<4x1xf32>
    %8 = vector.multi_reduction <add>, %7, %cst_4 [0] : vector<2x4x1xf32> to vector<4x1xf32>
    %9 = vector.shape_cast %8 : vector<4x1xf32> to vector<1x4x1xf32>
    %cst_5 = arith.constant 0.001953125 : f32
    %10 = vector.broadcast %cst_5 : f32 to vector<1x4x1xf32>
    %11 = arith.mulf %4, %10 : vector<1x4x1xf32>
    %cst_6 = arith.constant 0.001953125 : f32
    %12 = vector.broadcast %cst_6 : f32 to vector<1x4x1xf32>
    %13 = arith.mulf %9, %12 : vector<1x4x1xf32>
    %14 = arith.mulf %11, %11 : vector<1x4x1xf32>
    %15 = arith.subf %13, %14 : vector<1x4x1xf32>
    %cst_7 = arith.constant 9.99999974E-6 : f32
    %16 = vector.broadcast %cst_7 : f32 to vector<1x4x1xf32>
    %17 = arith.addf %15, %16 : vector<1x4x1xf32>
    %18 = math.rsqrt %17 : vector<1x4x1xf32>
    %c0_8 = arith.constant 0 : index
    %c0_9 = arith.constant 0 : index
    %c0_10 = arith.constant 0 : index
    %19 = vector.load %arg2[%c0_8, %c0_9, %c0_10] : memref<2x4x1xf32, #tpu.memory_space<vmem>>, vector<2x4x1xf32>
    %20 = vector.broadcast %18 : vector<1x4x1xf32> to vector<2x4x1xf32>
    %21 = arith.mulf %19, %20 : vector<2x4x1xf32>
    %c0_11 = arith.constant 0 : index
    %c0_12 = arith.constant 0 : index
    %c0_13 = arith.constant 0 : index
    %22 = vector.load %arg3[%c0_11, %c0_12, %c0_13] : memref<2x4x1xf32, #tpu.memory_space<vmem>>, vector<2x4x1xf32>
    %23 = vector.broadcast %11 : vector<1x4x1xf32> to vector<2x4x1xf32>
    %24 = arith.mulf %23, %21 : vector<2x4x1xf32>
    %25 = arith.subf %22, %24 : vector<2x4x1xf32>
    %26 = vector.broadcast %21 : vector<2x4x1xf32> to vector<2x4x256xf32>
    %27 = arith.mulf %26, %0 : vector<2x4x256xf32>
    %28 = vector.broadcast %25 : vector<2x4x1xf32> to vector<2x4x256xf32>
    %29 = arith.addf %27, %28 : vector<2x4x256xf32>
    %c0_14 = arith.constant 0 : index
    %c0_15 = arith.constant 0 : index
    %c0_16 = arith.constant 0 : index
    %30 = vector.load %arg4[%c0_14, %c0_15, %c0_16] : memref<2x4x256xf32, #tpu.memory_space<vmem>>, vector<2x4x256xf32>
    tpu.vector_store %arg4[%c0_14, %c0_15, %c0_16], %29 {strides = array<i32>} : memref<2x4x256xf32, #tpu.memory_space<vmem>>, vector<2x4x256xf32>,
    return
  }
  func.func @transform_0(%arg0: i32) -> (i32, i32, i32) {
    %c0_i32 = arith.constant 0 : i32
    %c0_i32_0 = arith.constant 0 : i32
    %c0_i32_1 = arith.constant 0 : i32
    %c0_i32_2 = arith.constant 0 : i32
    return %c0_i32, %c0_i32_0, %c0_i32_1 : i32, i32, i32
  }
  func.func @transform_1(%arg0: i32) -> (i32, i32, i32) {
    %c0_i32 = arith.constant 0 : i32
    %c0_i32_0 = arith.constant 0 : i32
    %c0_i32_1 = arith.constant 0 : i32
    %c0_i32_2 = arith.constant 0 : i32
    return %c0_i32, %c0_i32_0, %c0_i32_1 : i32, i32, i32
  }
  func.func @transform_2(%arg0: i32) -> (i32, i32, i32) {
    %c0_i32 = arith.constant 0 : i32
    %c0_i32_0 = arith.constant 0 : i32
    %c0_i32_1 = arith.constant 0 : i32
    %c0_i32_2 = arith.constant 0 : i32
    return %c0_i32, %c0_i32_0, %c0_i32_1 : i32, i32, i32
  }
  func.func @transform_3(%arg0: i32) -> (i32, i32, i32) {
    %c0_i32 = arith.constant 0 : i32
    %c0_i32_0 = arith.constant 0 : i32
    %c0_i32_1 = arith.constant 0 : i32
    %c0_i32_2 = arith.constant 0 : i32
    return %c0_i32, %c0_i32_0, %c0_i32_1 : i32, i32, i32
  }
}

</mosaic_0001>

<bundles_post_ra>
// kernel: tpu_custom_call.1
= control target key start
LH: loop header
LB: loop body
LE: loop exit
PB: predicated region body
PF: predicated region fallthrough
CT: control target
= control target key end

     0   :  { %s260_s0 = inlined_call_operand.vmem [shape: f32[2,4,256], index: 0, kind: input, shape index: {}]   ;;  %s261_s1 = inlined_call_operand.vmem [shape: f32[2,4,1], index: 1, kind: input, shape index: {}]   ;;  %s262_s2 = inlined_call_operand.vmem [shape: f32[2,4,1], index: 2, kind: input, shape index: {}]   ;;  %s263_s3 = inlined_call_operand.hbm [shape: f32[2,4,256], index: 3, kind: output, shape index: {}]  }
   0x1   :  { %v15_v0 = vld [vmem:[%s260_s0] sm:$0xff]  ;;  %v16_v1 = vld [vmem:[%s260_s0 + $0x8] sm:$0xff] }
   0x2   :  { %8 = vsyncpa [#allocation3], 0  ;;  %19 = vst [vmem:[#allocation1] ss:$2 sm:$0xff] %v15_v0  ;;  %v44_v2 = vmul.f32 %v15_v0, %v15_v0  ;;  %vm30_vm0 = vcmask 1043456   ;;  %v45_v3 = vmul.f32 %v16_v1, %v16_v1  ;;  %v201_v25 = vmov 0  }
   0x3   :  { %23 = vst [vmem:[#allocation1 + $0x10] ss:$2 sm:$0xff] %v16_v1  ;;  %170 = vset.pattern.permute.xlu2 %v201_v25  ;;  %172 = vset.pattern.permute.xlu1 %v201_v25  ;;  %v87_v46 = vld [vmem:[%s261_s1] sm:$0xf]  ;;  %v88_v47 = vld [vmem:[%s261_s1 + $0x4] sm:$0xf] }
   0x4   :  { %171 = vset.pattern.permute.xlu0 %v201_v25  ;;  %v92_v51 = vld [vmem:[%s262_s2 + $0x4] sm:$0xf]  ;;  %v91_v52 = vld [vmem:[%s262_s2] sm:$0xf]  ;;  %s202_s1 = smov [#allocation2]   ;;  %s154_s25 = sshll.u32 %s263_s3, 4  ;;  %s155_s25 = int_to_ptr.hbm [resolvable:$true] %s154_s25 }
   0x5   :  { %s152_s2 = sshll.u32 %s202_s1, 4  ;;  %s203_s26 = smov 128   ;;  %s153_s2 = int_to_ptr.vmem [resolvable:$true] %s152_s2 }
   0x6   :  { %s204_s27 = smov 8  }
   0x9   :  { %v20_v4 = vld.sshfl [vmem:[#allocation1] sm:$0xff pattern:$0x75316420]  ;;  %v21_v5 = vld.sshfl [vmem:[#allocation1 + $0x8] sm:$0xff pattern:$0x75316420] }
   0xa   :  { %v31_v6 = vsel %vm30_vm0, %v20_v4, 0.0  ;;  %v32_v7 = vsel %vm30_vm0, %v21_v5, 0.0  ;;  %48 = vst [vmem:[#allocation1] ss:$2 sm:$0xff] %v44_v2 }
   0xb   :  { %v33_v8 = vadd.f32 %v32_v7, %v31_v6  ;;  %v24_v9 = vld.sshfl [vmem:[#allocation1 + $0x10] sm:$0xff pattern:$0x75316420]  ;;  %v25_v10 = vld.sshfl [vmem:[#allocation1 + $0x18] sm:$0xff pattern:$0x75316420] }
   0xc   :  { %52 = vst [vmem:[#allocation1 + $0x10] ss:$2 sm:$0xff] %v45_v3  ;;  %v36_v11 = vsel %vm30_vm0, %v24_v9, 0.0  ;;  %v37_v12 = vsel %vm30_vm0, %v25_v10, 0.0 }
   0xd   :  { %34 = vadd.xlane.f32.xlu0 %v33_v8  ;;  %v38_v15 = vadd.f32 %v37_v12, %v36_v11 }
  0x11   :  { %v49_v13 = vld.sshfl [vmem:[#allocation1] sm:$0xff pattern:$0x75316420]  ;;  %v50_v14 = vld.sshfl [vmem:[#allocation1 + $0x8] sm:$0xff pattern:$0x75316420] }
  0x12   :  { %v59_v16 = vsel %vm30_vm0, %v49_v13, 0.0  ;;  %v60_v17 = vsel %vm30_vm0, %v50_v14, 0.0  ;;  %107 = vst [vmem:[#allocation1] ss:$2 sm:$0xff] %v15_v0 }
  0x13   :  { %v61_v18 = vadd.f32 %v60_v17, %v59_v16  ;;  %v53_v19 = vld.sshfl [vmem:[#allocation1 + $0x10] sm:$0xff pattern:$0x75316420]  ;;  %v54_v20 = vld.sshfl [vmem:[#allocation1 + $0x18] sm:$0xff pattern:$0x75316420] }
  0x14   :  { %111 = vst [vmem:[#allocation1 + $0x10] ss:$2 sm:$0xff] %v16_v1  ;;  %v64_v21 = vsel %vm30_vm0, %v53_v19, 0.0  ;;  %v65_v22 = vsel %vm30_vm0, %v54_v20, 0.0 }
  0x15   :  { %62 = vadd.xlane.f32.xlu1 %v61_v18  ;;  %39 = vadd.xlane.f32.xlu0 %v38_v15  ;;  %v66_v23 = vadd.f32 %v65_v22, %v64_v21 }
  0x19   :  { %v109_v58 = vld.sshfl [vmem:[#allocation1 + $0x8] sm:$0xff pattern:$0x75316420]  ;;  %v108_v61 = vld.sshfl [vmem:[#allocation1] sm:$0xff pattern:$0x75316420] }
  0x1b   :  { %v113_v59 = vld.sshfl [vmem:[#allocation1 + $0x18] sm:$0xff pattern:$0x75316420]  ;;  %v112_v62 = vld.sshfl [vmem:[#allocation1 + $0x10] sm:$0xff pattern:$0x75316420] }
  0x1d   :  { %67 = vadd.xlane.f32.xlu1 %v66_v23 }
  0x80   :  { %v35_v24 = vpop.xlane.xlu0 %34 }
  0x81   :  { %v41_v29 = vsel %vm30_vm0, %v35_v24, 0.0 }
  0x88   :  { %v63_v26 = vpop.xlane.xlu1 %62  ;;  %v40_v27 = vpop.xlane.xlu0 %39 }
  0x89   :  { %v42_v28 = vsel %vm30_vm0, %v40_v27, 0.0  ;;  %v69_v33 = vsel %vm30_vm0, %v63_v26, 0.0 }
  0x8a   :  { %v43_v30 = vadd.f32 %v42_v28, %v41_v29 }
  0x8c   :  { %v72_v31 = vmul.f32 0.001953125, %v43_v30 }
  0x8e   :  { %v74_v37 = vmul.f32 %v72_v31, %v72_v31 }
  0x90   :  { %v68_v32 = vpop.xlane.xlu1 %67 }
  0x91   :  { %v70_v34 = vsel %vm30_vm0, %v68_v32, 0.0 }
  0x92   :  { %v71_v35 = vadd.f32 %v70_v34, %v69_v33 }
  0x94   :  { %v73_v36 = vmul.f32 0.001953125, %v71_v35 }
  0x96   :  { %v75_v38 = vsub.f32 %v73_v36, %v74_v37 }
  0x98   :  { %v76_v39 = vadd.f32 1e-05, %v75_v38 }
  0x9a   :  { %173 = vrsqrt.f32 %v76_v39  ;;  %vm83_vm2 = vweird.f32 %v76_v39 }
  0xa0   :  { %v174_v40 = vpop.eup %173 }
  0xa1   :  { %v78_v41 = vmul.f32 %v174_v40, %v76_v39  ;;  %vm84_vm1 = vweird.f32 %v174_v40 }
  0xa2   :  { %vm85_vm3 = vmor %vm83_vm2, %vm84_vm1 }
  0xa3   :  { %v79_v42 = vmul.f32 %v174_v40, %v78_v41 }
  0xa5   :  { %v80_v43 = vmul.f32 0.5, %v79_v42 }
  0xa7   :  { %v81_v44 = vsub.f32 1.5, %v80_v43 }
  0xa9   :  { %v82_v45 = vmul.f32 %v174_v40, %v81_v44 }
  0xab   :  { %v86_v48 = vsel %vm85_vm3, %v174_v40, %v82_v45 }
  0xac   :  { %v89_v49 = vmul.f32 %v87_v46, %v86_v48  ;;  %v90_v50 = vmul.f32 %v88_v47, %v86_v48 }
  0xae   :  { %v94_v53 = vmul.f32 %v90_v50, %v72_v31  ;;  %99 = vperm.xlu2 %170, %v89_v49   ;;  %v93_v54 = vmul.f32 %v89_v49, %v72_v31 }
  0xb0   :  { %v96_v55 = vsub.f32 %v92_v51, %v94_v53  ;;  %v95_v56 = vsub.f32 %v91_v52, %v93_v54 }
  0xb2   :  { %129 = vperm.xlu1 %172, %v96_v55   ;;  %124 = vperm.xlu0 %171, %v95_v56  }
  0xb6   :  { %104 = vperm.xlu2 %170, %v90_v50  }
 0x108   :  { %v100_v57 = vpop.permute.xlu2 %99 }
 0x109   :  { %v119_v63 = vmul.f32 %v109_v58, %v100_v57  ;;  %v118_v3 = vmul.f32 %v108_v61, %v100_v57 }
 0x110   :  { %v105_v60 = vpop.permute.xlu2 %104 }
 0x111   :  { %v121_v0 = vmul.f32 %v113_v59, %v105_v60  ;;  %v120_v4 = vmul.f32 %v112_v62, %v105_v60 }
 0x124   :  { %v130_v1 = vpop.permute.xlu1 %129  ;;  %v125_v2 = vpop.permute.xlu0 %124 }
 0x125   :  { %v135_v5 = vadd.f32 %v130_v1, %v121_v0  ;;  %v133_v6 = vadd.f32 %v125_v2, %v119_v63  ;;  %v134_v7 = vadd.f32 %v130_v1, %v120_v4  ;;  %v132_v9 = vadd.f32 %v125_v2, %v118_v3 }
 0x127   :  { %v141_v8 = vrot.slane %v135_v5, 4  ;;  %v140_v10 = vrot.slane %v133_v6, 4 }
 0x129   :  { %v143_v11 = vsel %vm30_vm0, %v134_v7, %v141_v8  ;;  %v142_v12 = vsel %vm30_vm0, %v132_v9, %v140_v10 }
 0x12a   :  { %147 = vst [vmem:[#allocation2 + $0x8] sm:$0xff] %v143_v11 }
 0x12b   :  { %146 = vst [vmem:[#allocation2] sm:$0xff] %v142_v12 }
 0x12c   :  { %160 = dma.vmem_to_hbm [thread:$0]  %s153_s2, 256, %s155_s25, [#allocation3], %s203_s26, %s203_s26, %s204_s27  }
 0x12d   :  { %199 = dma.done.wait [#allocation3], 256  }
 0x12e   :  { %200 = vsyncadd [#allocation3], 4294967040 }
 0x12f   :  { %165 = vsyncpa [#allocation3], 1 }

</bundles_post_ra>
